<compile_context>
chip_gen: v7x
topology: tpu7x:2x2x1
jax: 0.10.0
libtpu: 0.0.40
codegen_flags: <defaults>
</compile_context>

<pallas_src>
import functools

import jax
import jax.numpy as jnp
from jax.experimental import pallas as pl
from jax.experimental.pallas import tpu as pltpu


def _calc_inner_dim(n_hidden: int, inner_dim_scale: float, inner_dim_to_multiple: int) -> int:
    inner_dim = n_hidden
    if inner_dim_scale != 1.0:
        inner_dim = int(n_hidden * inner_dim_scale)
    if inner_dim_to_multiple != 1:
        inner_dim = inner_dim_to_multiple * (
            (inner_dim + inner_dim_to_multiple - 1) // inner_dim_to_multiple
        )
    return inner_dim


def _round_up(a: int, b: int) -> int:
    return (a + b - 1) // b * b


def _pad2(a, rows: int, cols: int):
    pr, pc = rows - a.shape[0], cols - a.shape[1]
    if pr or pc:
        a = jnp.pad(a, ((0, pr), (0, pc)))
    return a


def _vmem_estimate(tile_m, tile_n, d_model_p, w_itemsize, io_itemsize):
    """Rough double-buffered VMEM footprint of one grid step (bytes)."""
    x_tile = 2 * tile_m * d_model_p * io_itemsize
    wgi_tile = 2 * d_model_p * (2 * tile_n) * w_itemsize
    bgi_tile = 2 * (2 * tile_n) * w_itemsize
    wo_tile = 2 * tile_n * d_model_p * w_itemsize
    bo_tile = 2 * d_model_p * w_itemsize
    out_tile = 2 * tile_m * d_model_p * io_itemsize
    acc = tile_m * d_model_p * 4
    temps = 2 * tile_m * (2 * tile_n) * 4  # gh / z live-value headroom
    return x_tile + wgi_tile + bgi_tile + wo_tile + bo_tile + out_tile + acc + temps


def _glu_ffn_kernel(x_ref, wgi_ref, bgi_ref, wo_ref, bo_ref, o_ref, acc_ref, *, tile_n):
    k = pl.program_id(1)

    @pl.when(k == 0)
    def _():
        acc_ref[...] = jnp.zeros_like(acc_ref)

    x = x_ref[...]  # keep native dtype (bf16 stays bf16) for the MXU

    # Fused gate+inner projection for this inner_dim chunk: [g | h], f32 accumulate.
    gh = jnp.dot(x, wgi_ref[...], preferred_element_type=jnp.float32)
    gh = gh + bgi_ref[...].astype(jnp.float32)
    g = gh[:, :tile_n]
    h = gh[:, tile_n:]

    # SiLU + GLU gating in f32 (EUP-friendly), then back to weight dtype for the MXU.
    g = g * jax.nn.sigmoid(g)
    z = (h * g).astype(wo_ref.dtype)

    # TODO(synk): reference forward calls self.dropout(x) but discards the result,
    # so dropout is intentionally a no-op here.

    # Accumulate the output projection over inner_dim chunks.
    acc_ref[...] += jnp.dot(z, wo_ref[...], preferred_element_type=jnp.float32)

    @pl.when(k == pl.num_programs(1) - 1)
    def _():
        o_ref[...] = (acc_ref[...] + bo_ref[...].astype(jnp.float32)).astype(o_ref.dtype)


def glu_ffn_pallas(x, wg, bg, wi, bi, wo, bo, *, tile_m=256, tile_n=512,
                   vmem_budget_bytes=40 * 1024 * 1024, interpret=False):
    """x: (..., d_model). Weights already transposed to [in, out]; biases (out,) or (1, out)."""
    d_model = x.shape[-1]
    inner_dim = wg.shape[1]
    assert wi.shape == (d_model, inner_dim)
    assert wo.shape == (inner_dim, d_model)

    lead_shape = x.shape[:-1]
    x2 = x.reshape(-1, d_model)
    n_tokens = x2.shape[0]

    w_itemsize = jnp.dtype(wg.dtype).itemsize
    io_itemsize = jnp.dtype(x.dtype).itemsize

    # Lane-dense feature dims (multiples of 128) -> unmasked vst stores.
    d_model_p = _round_up(d_model, 128)

    # --- pick tiles: as large as the VMEM budget allows ---
    tile_m = min(tile_m, _round_up(n_tokens, 8))
    tile_m = max(8, tile_m - tile_m % 8)
    tile_n = min(tile_n, _round_up(inner_dim, 128))
    tile_n = _round_up(tile_n, 128)
    while True:
        est = _vmem_estimate(tile_m, tile_n, d_model_p, w_itemsize, io_itemsize)
        if est <= vmem_budget_bytes:
            break
        if tile_n > 128:
            tile_n = max(128, _round_up(tile_n // 2, 128))
        elif tile_m > 128:
            tile_m = max(128, tile_m // 2)
        else:
            break

    n_tok_p = _round_up(n_tokens, tile_m)
    inner_p = _round_up(inner_dim, tile_n)
    n_chunks = inner_p // tile_n

    # Zero-pad operands (padded rows/cols contribute exactly zero to the result).
    x2_p = _pad2(x2, n_tok_p, d_model_p)
    wg_p = _pad2(wg, d_model_p, inner_p)
    wi_p = _pad2(wi, d_model_p, inner_p)
    bg_p = _pad2(bg.reshape(1, -1), 1, inner_p)
    bi_p = _pad2(bi.reshape(1, -1), 1, inner_p)
    wo_p = _pad2(wo, inner_p, d_model_p)
    bo_p = _pad2(bo.reshape(1, -1), 1, d_model_p)

    # Fuse gate + inner projections: chunk-interleave so every (d_model_p, 2*tile_n)
    # block is [Wg_chunk | Wi_chunk] -> one wide MXU matmul per chunk.
    wgi = jnp.stack(
        [wg_p.reshape(d_model_p, n_chunks, tile_n),
         wi_p.reshape(d_model_p, n_chunks, tile_n)], axis=2,
    ).reshape(d_model_p, n_chunks * 2 * tile_n)
    bgi = jnp.stack(
        [bg_p.reshape(1, n_chunks, tile_n),
         bi_p.reshape(1, n_chunks, tile_n)], axis=2,
    ).reshape(1, n_chunks * 2 * tile_n)

    # Only raise the scoped VMEM limit if our tiles could exceed the smallest
    # default (v5e ~16 MiB); 56 MiB stays safely under v7x's 64 MiB physical VMEM.
    est = _vmem_estimate(tile_m, tile_n, d_model_p, w_itemsize, io_itemsize)
    vmem_limit = 56 * 1024 * 1024 if est > 16 * 1024 * 1024 else None

    kernel = functools.partial(_glu_ffn_kernel, tile_n=tile_n)
    grid = (n_tok_p // tile_m, n_chunks)

    out2 = pl.pallas_call(
        kernel,
        out_shape=jax.ShapeDtypeStruct((n_tok_p, d_model_p), x.dtype),
        grid_spec=pltpu.PrefetchScalarGridSpec(
            num_scalar_prefetch=0,
            grid=grid,
            in_specs=[
                pl.BlockSpec((tile_m, d_model_p), lambda i, k: (i, 0)),      # x token tile
                pl.BlockSpec((d_model_p, 2 * tile_n), lambda i, k: (0, k)),  # [Wg|Wi] chunk
                pl.BlockSpec((1, 2 * tile_n), lambda i, k: (0, k)),          # [bg|bi] chunk
                pl.BlockSpec((tile_n, d_model_p), lambda i, k: (k, 0)),      # Wo chunk
                pl.BlockSpec((1, d_model_p), lambda i, k: (0, 0)),           # bo
            ],
            out_specs=pl.BlockSpec((tile_m, d_model_p), lambda i, k: (i, 0)),
            scratch_shapes=[pltpu.VMEM((tile_m, d_model_p), jnp.float32)],
        ),
        compiler_params=pltpu.CompilerParams(
            dimension_semantics=("parallel", "arbitrary"),
            vmem_limit_bytes=vmem_limit,
        ),
        interpret=interpret,
    )(x2_p, wgi, bgi, wo_p, bo_p)

    out2 = out2[:n_tokens, :d_model]
    return out2.reshape(*lead_shape, d_model)


def init_params(key, d_model, n_hidden, *, inner_dim_scale=2 / 3, inner_dim_to_multiple=1,
                dtype=jnp.float32):
    """Deterministic PyTorch-Linear-style init (uniform +/- 1/sqrt(fan_in))."""
    inner_dim = _calc_inner_dim(n_hidden, inner_dim_scale, inner_dim_to_multiple)
    k = jax.random.split(key, 6)

    def lin(kw, kb, fan_in, fan_out):
        bound = 1.0 / jnp.sqrt(fan_in)
        w = jax.random.uniform(kw, (fan_in, fan_out), dtype, -bound, bound)  # [in, out]
        b = jax.random.uniform(kb, (1, fan_out), dtype, -bound, bound)
        return w, b

    wg, bg = lin(k[0], k[1], d_model, inner_dim)
    wi, bi = lin(k[2], k[3], d_model, inner_dim)
    wo, bo = lin(k[4], k[5], inner_dim, d_model)
    return (wg, bg, wi, bi, wo, bo), inner_dim


def reference_glu_ffn(x, wg, bg, wi, bi, wo, bo):
    g = x @ wg + bg
    g = g * jax.nn.sigmoid(g)
    h = x @ wi + bi
    z = h * g
    return z @ wo + bo


if __name__ == "__main__":
    # Small shapes consistent with the module: batch=2, seq=8, d_model=32, n_hidden=48
    # -> inner_dim = int(48 * 2/3) = 32
    batch, seq, d_model, n_hidden = 2, 8, 32, 48
    key = jax.random.PRNGKey(0)
    kx, kp = jax.random.split(key)

    x = jax.random.normal(kx, (batch, seq, d_model), dtype=jnp.float32)
    (wg, bg, wi, bi, wo, bo), inner_dim = init_params(kp, d_model, n_hidden)

    # f32 path: exact check against pure-JAX reference.
    out = glu_ffn_pallas(x, wg, bg, wi, bi, wo, bo)
    out = jax.block_until_ready(out)
    ref = reference_glu_ffn(x, wg, bg, wi, bi, wo, bo)
    assert out.shape == (batch, seq, d_model)
    assert jnp.allclose(out, ref, atol=1e-5, rtol=1e-5), "f32 mismatch vs pure-JAX reference"

    # bf16 mixed-precision path: native-dtype MXU operands, f32 accumulate.
    xb = x.astype(jnp.bfloat16)
    pb = [p.astype(jnp.bfloat16) for p in (wg, bg, wi, bi, wo, bo)]
    outb = jax.block_until_ready(glu_ffn_pallas(xb, *pb))
    assert outb.shape == (batch, seq, d_model)
    assert jnp.allclose(outb.astype(jnp.float32), ref, atol=1e-1, rtol=1e-1), \
        "bf16 mismatch vs pure-JAX reference"

    print("KERNEL_OK")
</pallas_src>

<mosaic_0001>
module attributes {stable_mosaic.version = 11 : i64} {
  func.func @_glu_ffn_kernel(%arg0: i32, %arg1: i32, %arg2: memref<16x128xf32, #tpu.memory_space<vmem>>, %arg3: memref<128x256xf32, #tpu.memory_space<vmem>>, %arg4: memref<1x256xf32, #tpu.memory_space<vmem>>, %arg5: memref<128x128xf32, #tpu.memory_space<vmem>>, %arg6: memref<1x128xf32, #tpu.memory_space<vmem>>, %arg7: memref<16x128xf32, #tpu.memory_space<vmem>>, %arg8: memref<16x128xf32, #tpu.memory_space<vmem>>) attributes {dimension_semantics = [#tpu.dimension_semantics<parallel>, #tpu.dimension_semantics<arbitrary>], iteration_bounds = array<i64: 1, 1>, scalar_prefetch = 0 : i64, scratch_operands = 1 : i64, tpu.core_type = #tpu.core_type<tc>, window_params = [{transform_indices = @transform_0, window_bounds = array<i64: 16, 128>}, {transform_indices = @transform_1, window_bounds = array<i64: 128, 256>}, {transform_indices = @transform_2, window_bounds = array<i64: 1, 256>}, {transform_indices = @transform_3, window_bounds = array<i64: 128, 128>}, {pipeline_mode = #tpu.pipeline_mode<synchronous>, transform_indices = @transform_4, window_bounds = array<i64: 1, 128>}, {transform_indices = @transform_5, window_bounds = array<i64: 16, 128>}]} {
    %c0_i32 = arith.constant 0 : i32
    %0 = arith.cmpi eq, %arg1, %c0_i32 : i32
    %1 = arith.extui %0 : i1 to i32
    %c0_i32_0 = arith.constant 0 : i32
    %2 = arith.cmpi ne, %1, %c0_i32_0 : i32
    scf.if %2 {
      %cst_16 = arith.constant 0.000000e+00 : f32
      %26 = vector.broadcast %cst_16 : f32 to vector<16x128xf32>
      %c0_17 = arith.constant 0 : index
      %c0_18 = arith.constant 0 : index
      %27 = vector.load %arg8[%c0_17, %c0_18] : memref<16x128xf32, #tpu.memory_space<vmem>>, vector<16x128xf32>
      tpu.vector_store %arg8[%c0_17, %c0_18], %26 {strides = array<i32>} : memref<16x128xf32, #tpu.memory_space<vmem>>, vector<16x128xf32>,
    } else {
    }
    %c0 = arith.constant 0 : index
    %c0_1 = arith.constant 0 : index
    %3 = vector.load %arg2[%c0, %c0_1] : memref<16x128xf32, #tpu.memory_space<vmem>>, vector<16x128xf32>
    %c0_2 = arith.constant 0 : index
    %c0_3 = arith.constant 0 : index
    %4 = vector.load %arg3[%c0_2, %c0_3] : memref<128x256xf32, #tpu.memory_space<vmem>>, vector<128x256xf32>
    %cst = arith.constant dense<0.000000e+00> : vector<16x256xf32>
    %5 = tpu.matmul %3, %4, %cst {dimension_numbers = #tpu.dot_dimension_numbers<[1], [0], [0], [1], [0, 0, 1, 1], [], []>} : vector<16x128xf32>, vector<128x256xf32>, vector<16x256xf32> -> vector<16x256xf32>
    %c0_4 = arith.constant 0 : index
    %c0_5 = arith.constant 0 : index
    %6 = vector.load %arg4[%c0_4, %c0_5] : memref<1x256xf32, #tpu.memory_space<vmem>>, vector<1x256xf32>
    %7 = vector.broadcast %6 : vector<1x256xf32> to vector<16x256xf32>
    %8 = arith.addf %5, %7 : vector<16x256xf32>
    %9 = vector.extract_strided_slice %8 {offsets = [0, 0], sizes = [16, 128], strides = [1, 1]} : vector<16x256xf32> to vector<16x128xf32>
    %10 = vector.extract_strided_slice %8 {offsets = [0, 128], sizes = [16, 128], strides = [1, 1]} : vector<16x256xf32> to vector<16x128xf32>
    %11 = arith.negf %9 : vector<16x128xf32>
    %12 = math.exp %11 : vector<16x128xf32>
    %cst_6 = arith.constant 1.000000e+00 : f32
    %13 = vector.broadcast %cst_6 : f32 to vector<16x128xf32>
    %14 = arith.addf %13, %12 : vector<16x128xf32>
    %15 = arith.divf %13, %14 : vector<16x128xf32>
    %16 = arith.mulf %9, %15 : vector<16x128xf32>
    %17 = arith.mulf %10, %16 : vector<16x128xf32>
    %c0_7 = arith.constant 0 : index
    %c0_8 = arith.constant 0 : index
    %18 = vector.load %arg8[%c0_7, %c0_8] : memref<16x128xf32, #tpu.memory_space<vmem>>, vector<16x128xf32>
    %c0_9 = arith.constant 0 : index
    %c0_10 = arith.constant 0 : index
    %19 = vector.load %arg5[%c0_9, %c0_10] : memref<128x128xf32, #tpu.memory_space<vmem>>, vector<128x128xf32>
    %cst_11 = arith.constant dense<0.000000e+00> : vector<16x128xf32>
    %20 = tpu.matmul %17, %19, %cst_11 {dimension_numbers = #tpu.dot_dimension_numbers<[1], [0], [0], [1], [0, 0, 1, 1], [], []>} : vector<16x128xf32>, vector<128x128xf32>, vector<16x128xf32> -> vector<16x128xf32>
    %21 = arith.addf %18, %20 : vector<16x128xf32>
    %c0_12 = arith.constant 0 : index
    %c0_13 = arith.constant 0 : index
    %22 = vector.load %arg8[%c0_12, %c0_13] : memref<16x128xf32, #tpu.memory_space<vmem>>, vector<16x128xf32>
    tpu.vector_store %arg8[%c0_12, %c0_13], %21 {strides = array<i32>} : memref<16x128xf32, #tpu.memory_space<vmem>>, vector<16x128xf32>,
    %c0_i32_14 = arith.constant 0 : i32
    %23 = arith.cmpi eq, %arg1, %c0_i32_14 : i32
    %24 = arith.extui %23 : i1 to i32
    %c0_i32_15 = arith.constant 0 : i32
    %25 = arith.cmpi ne, %24, %c0_i32_15 : i32
    scf.if %25 {
      %c0_16 = arith.constant 0 : index
      %c0_17 = arith.constant 0 : index
      %26 = vector.load %arg8[%c0_16, %c0_17] : memref<16x128xf32, #tpu.memory_space<vmem>>, vector<16x128xf32>
      %c0_18 = arith.constant 0 : index
      %c0_19 = arith.constant 0 : index
      %27 = vector.load %arg6[%c0_18, %c0_19] : memref<1x128xf32, #tpu.memory_space<vmem>>, vector<1x128xf32>
      %28 = vector.broadcast %27 : vector<1x128xf32> to vector<16x128xf32>
      %29 = arith.addf %26, %28 : vector<16x128xf32>
      %c0_20 = arith.constant 0 : index
      %c0_21 = arith.constant 0 : index
      %30 = vector.load %arg7[%c0_20, %c0_21] : memref<16x128xf32, #tpu.memory_space<vmem>>, vector<16x128xf32>
      tpu.vector_store %arg7[%c0_20, %c0_21], %29 {strides = array<i32>} : memref<16x128xf32, #tpu.memory_space<vmem>>, vector<16x128xf32>,
    } else {
    }
    return
  }
  func.func @transform_0(%arg0: i32, %arg1: i32) -> (i32, i32) {
    %c0_i32 = arith.constant 0 : i32
    %c0_i32_0 = arith.constant 0 : i32
    return %arg0, %c0_i32 : i32, i32
  }
  func.func @transform_1(%arg0: i32, %arg1: i32) -> (i32, i32) {
    %c0_i32 = arith.constant 0 : i32
    %c0_i32_0 = arith.constant 0 : i32
    return %c0_i32, %arg1 : i32, i32
  }
  func.func @transform_2(%arg0: i32, %arg1: i32) -> (i32, i32) {
    %c0_i32 = arith.constant 0 : i32
    %c0_i32_0 = arith.constant 0 : i32
    return %c0_i32, %arg1 : i32, i32
  }
  func.func @transform_3(%arg0: i32, %arg1: i32) -> (i32, i32) {
    %c0_i32 = arith.constant 0 : i32
    %c0_i32_0 = arith.constant 0 : i32
    return %arg1, %c0_i32 : i32, i32
  }
  func.func @transform_4(%arg0: i32, %arg1: i32) -> (i32, i32) {
    %c0_i32 = arith.constant 0 : i32
    %c0_i32_0 = arith.constant 0 : i32
    %c0_i32_1 = arith.constant 0 : i32
    return %c0_i32, %c0_i32_0 : i32, i32
  }
  func.func @transform_5(%arg0: i32, %arg1: i32) -> (i32, i32) {
    %c0_i32 = arith.constant 0 : i32
    %c0_i32_0 = arith.constant 0 : i32
    return %arg0, %c0_i32 : i32, i32
  }
}

</mosaic_0001>

<bundles_post_ra>
// kernel: tpu_custom_call.1
= control target key start
LH: loop header
LB: loop body
LE: loop exit
PB: predicated region body
PF: predicated region fallthrough
CT: control target
= control target key end

     0   :  { %10 = vsyncpa [#allocation4], 0  ;;  %s673_s0 = inlined_call_operand.hbm [shape: f32[16,128], index: 0, kind: input, shape index: {}]   ;;  %s674_s1 = inlined_call_operand.hbm [shape: f32[128,256], index: 1, kind: input, shape index: {}]   ;;  %s675_s2 = inlined_call_operand.vmem [shape: f32[1,256], index: 2, kind: input, shape index: {}]   ;;  %s676_s3 = inlined_call_operand.hbm [shape: f32[128,128], index: 3, kind: input, shape index: {}]   ;;  %s677_s4 = inlined_call_operand.vmem [shape: f32[1,128], index: 4, kind: input, shape index: {}]   ;;  %s678_s5 = inlined_call_operand.hbm [shape: f32[16,128], index: 5, kind: output, shape index: {}]  }
   0x1   :  { %11 = vsyncpa [#allocation7], 0 }
   0x2   :  { %12 = vsyncpa [#allocation5], 0  ;;  %s569_s18 = smov [#allocation6]   ;;  %s475_s22 = scalar_lea.hbm %s674_s1, 4096 }
   0x3   :  { %s30_s19 = sshll.u32 %s569_s18, 4  ;;  %p476_p0 = scmp.ne.s32.totalorder %s674_s1, %s475_s22  ;;  %s31_s19 = int_to_ptr.vmem [resolvable:$true] %s30_s19 }
   0x4   :  { %p479_p1 = scmp.lt.u32.totalorder %s475_s22, %s674_s1 }
   0x6   :  { %p481_p2 = pnand %p479_p1, %p476_p0 }
   0x8   :  { %484 = shalt.err (!%p481_p2)
}
   0x9   :  { %s485_s27 = scalar_lea.vmem %s31_s19, 4096  ;;  %p490_p4 = scmp.lt.s32.totalorder %s31_s19, %s31_s19 }
   0xa   :  { %p486_p3 = scmp.ne.s32.totalorder %s31_s19, %s485_s27  ;;  %p491_p5 = scmp.lt.s32.totalorder %s485_s27, %s485_s27 }
   0xc   :  { %p492_p6 = por %p491_p5, %p490_p4 }
   0xe   :  { %p493_p7 = pnand %p492_p6, %p486_p3 }
  0x10   :  { %496 = shalt.err (!%p493_p7)
}
  0x11   :  { %s570_s28 = smov 256   ;;  %s571_s29 = smov 16  }
  0x12   :  { %36 = dma.hbm_to_vmem [thread:$0]  %s674_s1, 4096, %s31_s19, [#allocation7], %s570_s28, %s570_s28, %s571_s29  }
  0x13   :  { %s572_s7 = smov [#allocation3]   ;;  %s497_s11 = scalar_lea.hbm %s673_s0, 256 }
  0x14   :  { %s18_s8 = sshll.u32 %s572_s7, 4  ;;  %p498_p8 = scmp.ne.s32.totalorder %s673_s0, %s497_s11  ;;  %s19_s8 = int_to_ptr.vmem [resolvable:$true] %s18_s8 }
  0x15   :  { %p501_p9 = scmp.lt.u32.totalorder %s497_s11, %s673_s0 }
  0x17   :  { %p503_p10 = pnand %p501_p9, %p498_p8 }
  0x19   :  { %506 = shalt.err (!%p503_p10)
}
  0x1a   :  { %s507_s16 = scalar_lea.vmem %s19_s8, 256  ;;  %p512_p12 = scmp.lt.s32.totalorder %s19_s8, %s19_s8 }
  0x1b   :  { %p508_p11 = scmp.ne.s32.totalorder %s19_s8, %s507_s16  ;;  %p513_p13 = scmp.lt.s32.totalorder %s507_s16, %s507_s16 }
  0x1d   :  { %p514_p0 = por %p513_p13, %p512_p12 }
  0x1f   :  { %p515_p1 = pnand %p514_p0, %p508_p11 }
  0x21   :  { %518 = shalt.err (!%p515_p1)
}
  0x22   :  { %s573_s1 = smov 128   ;;  %s574_s17 = smov 8  }
  0x23   :  { %24 = dma.hbm_to_vmem [thread:$0]  %s673_s0, 256, %s19_s8, [#allocation4], %s573_s1, %s573_s1, %s574_s17  }
  0x24   :  { %s575_s20 = smov [#allocation8]   ;;  %s519_s24 = scalar_lea.hbm %s676_s3, 2048 }
  0x25   :  { %s44_s21 = sshll.u32 %s575_s20, 4  ;;  %p520_p2 = scmp.ne.s32.totalorder %s676_s3, %s519_s24  ;;  %s45_s21 = int_to_ptr.vmem [resolvable:$true] %s44_s21 }
  0x26   :  { %p523_p3 = scmp.lt.u32.totalorder %s519_s24, %s676_s3 }
  0x28   :  { %p525_p4 = pnand %p523_p3, %p520_p2 }
  0x2a   :  { %528 = shalt.err (!%p525_p4)
}
  0x2b   :  { %s529_s29 = scalar_lea.vmem %s45_s21, 2048  ;;  %p534_p6 = scmp.lt.s32.totalorder %s45_s21, %s45_s21 }
  0x2c   :  { %p530_p5 = scmp.ne.s32.totalorder %s45_s21, %s529_s29  ;;  %p535_p7 = scmp.lt.s32.totalorder %s529_s29, %s529_s29 }
  0x2e   :  { %p536_p8 = por %p535_p7, %p534_p6 }
  0x30   :  { %p537_p9 = pnand %p536_p8, %p530_p5 }
  0x32   :  { %540 = shalt.err (!%p537_p9)
}
  0x33   :  { %50 = dma.hbm_to_vmem [thread:$0]  %s676_s3, 2048, %s45_s21, [#allocation7], %s573_s1, %s573_s1, %s574_s17  }
  0x34   :  { %563 = dma.done.wait [#allocation4], 256  }
  0x35   :  { %564 = vsyncadd [#allocation4], 4294967040 }
  0x36   :  { %565 = dma.done.wait [#allocation7], 6144  }
  0x37   :  { %566 = vsyncadd [#allocation7], 4294961152  ;;  %v576_v0 = vmov 0.0   ;;  %v71_v1 = vld [vmem:[#allocation6 + $0x8] sm:$0xff]  ;;  %v73_v2 = vld [vmem:[#allocation6 + $0x18] sm:$0xff]  ;;  %s577_s8 = smov [#allocation9]  }
  0x38   :  { %178 = vmatprep.mubr.f32.mxu0 %v576_v0  ;;  %v70_v3 = vld [vmem:[#allocation6] sm:$0xff]  ;;  %v394_v4 = vpack.c.bf16 %v73_v2, %v71_v1  ;;  %v72_v5 = vld [vmem:[#allocation6 + $0x10] sm:$0xff]  ;;  %v75_v6 = vld [vmem:[#allocation6 + $0x28] sm:$0xff]  ;;  %s325_s9 = sshll.u32 %s577_s8, 4  ;;  %s326_s9 = int_to_ptr.vmem [resolvable:$true] %s325_s9 }
  0x39   :  { %v77_v7 = vld [vmem:[#allocation6 + $0x38] sm:$0xff]  ;;  %v396_v8 = vpack.c.bf16 %v72_v5, %v70_v3  ;;  %v74_v10 = vld [vmem:[#allocation6 + $0x20] sm:$0xff]  ;;  %v76_v11 = vld [vmem:[#allocation6 + $0x30] sm:$0xff]  ;;  %s541_s10 = scalar_lea.vmem %s326_s9, 256  ;;  %p546_p11 = scmp.lt.s32.totalorder %s326_s9, %s326_s9 }
  0x3a   :  { %v398_v9 = vpack.c.bf16 %v77_v7, %v75_v6  ;;  %v79_v12 = vld [vmem:[#allocation6 + $0x48] sm:$0xff]  ;;  %395 = vmatprep.subr.bf16.mxu0 %v394_v4  ;;  %v81_v13 = vld [vmem:[#allocation6 + $0x58] sm:$0xff]  ;;  %v400_v14 = vpack.c.bf16 %v76_v11, %v74_v10  ;;  %v78_v16 = vld [vmem:[#allocation6 + $0x40] sm:$0xff]  ;;  %v104_v11 = vlaneseq  ;;  %p542_p10 = scmp.ne.s32.totalorder %s326_s9, %s541_s10  ;;  %p547_p12 = scmp.lt.s32.totalorder %s541_s10, %s541_s10 }
  0x3b   :  { %397 = vmatpush1.bf16.msra.mxu0 %v396_v8  ;;  %v402_v15 = vpack.c.bf16 %v81_v13, %v79_v12  ;;  %v80_v17 = vld [vmem:[#allocation6 + $0x50] sm:$0xff]  ;;  %v83_v18 = vld [vmem:[#allocation6 + $0x68] sm:$0xff]  ;;  %v85_v19 = vld [vmem:[#allocation6 + $0x78] sm:$0xff] }
  0x3c   :  { %399 = vmatprep.subr.bf16.mxu0 %v398_v9  ;;  %v404_v20 = vpack.c.bf16 %v80_v17, %v78_v16  ;;  %v406_v21 = vpack.c.bf16 %v85_v19, %v83_v18  ;;  %v82_v22 = vld [vmem:[#allocation6 + $0x60] sm:$0xff]  ;;  %v84_v23 = vld [vmem:[#allocation6 + $0x70] sm:$0xff]  ;;  %v87_v24 = vld [vmem:[#allocation6 + $0x88] sm:$0xff]  ;;  %v105_v12 = vshrl.u32 %v104_v11, 7  ;;  %p548_p13 = por %p547_p12, %p546_p11 }
  0x3d   :  { %v89_v25 = vld [vmem:[#allocation6 + $0x98] sm:$0xff]  ;;  %v408_v26 = vpack.c.bf16 %v84_v23, %v82_v22  ;;  %v86_v28 = vld [vmem:[#allocation6 + $0x80] sm:$0xff]  ;;  %v88_v29 = vld [vmem:[#allocation6 + $0x90] sm:$0xff] }
  0x3e   :  { %v410_v27 = vpack.c.bf16 %v89_v25, %v87_v24  ;;  %v91_v30 = vld [vmem:[#allocation6 + $0xa8] sm:$0xff]  ;;  %v93_v31 = vld [vmem:[#allocation6 + $0xb8] sm:$0xff]  ;;  %v412_v32 = vpack.c.bf16 %v88_v29, %v86_v28  ;;  %v90_v34 = vld [vmem:[#allocation6 + $0xa0] sm:$0xff]  ;;  %v106_v13 = vsub.s32 0, %v105_v12  ;;  %v110_v28 = vsub.s32 1, %v105_v12  ;;  %p549_p0 = pnand %p548_p13, %p542_p10 }
  0x3f   :  { %401 = vmatpush1.bf16.msra.mxu0 %v400_v14  ;;  %v414_v33 = vpack.c.bf16 %v93_v31, %v91_v30  ;;  %v92_v35 = vld [vmem:[#allocation6 + $0xb0] sm:$0xff]  ;;  %v95_v36 = vld [vmem:[#allocation6 + $0xc8] sm:$0xff]  ;;  %v97_v37 = vld [vmem:[#allocation6 + $0xd8] sm:$0xff] }
  0x40   :  { %403 = vmatprep.subr.bf16.mxu0 %v402_v15  ;;  %v416_v38 = vpack.c.bf16 %v92_v35, %v90_v34  ;;  %v418_v39 = vpack.c.bf16 %v97_v37, %v95_v36  ;;  %v94_v40 = vld [vmem:[#allocation6 + $0xc0] sm:$0xff]  ;;  %v96_v41 = vld [vmem:[#allocation6 + $0xd0] sm:$0xff]  ;;  %v99_v42 = vld [vmem:[#allocation6 + $0xe8] sm:$0xff] }
  0x41   :  { %v101_v43 = vld [vmem:[#allocation6 + $0xf8] sm:$0xff]  ;;  %v420_v44 = vpack.c.bf16 %v96_v41, %v94_v40  ;;  %v98_v46 = vld [vmem:[#allocation6 + $0xe0] sm:$0xff]  ;;  %v100_v47 = vld [vmem:[#allocation6 + $0xf0] sm:$0xff] }
  0x42   :  { %v422_v45 = vpack.c.bf16 %v101_v43, %v99_v42  ;;  %v424_v48 = vpack.c.bf16 %v100_v47, %v98_v46  ;;  %v68_v49 = vld [vmem:[#allocation3] sm:$0xff]  ;;  %v69_v50 = vld [vmem:[#allocation3 + $0x8] sm:$0xff]  ;;  %v209_v51 = vld [vmem:[#allocation8] sm:$0xff] }
  0x43   :  { %405 = vmatpush1.bf16.msra.mxu0 %v404_v20  ;;  %v210_v52 = vld [vmem:[#allocation8 + $0x8] sm:$0xff]  ;;  %v211_v54 = vld [vmem:[#allocation8 + $0x10] sm:$0xff]  ;;  %v212_v55 = vld [vmem:[#allocation8 + $0x18] sm:$0xff] }
  0x44   :  { %407 = vmatprep.subr.bf16.mxu0 %v406_v21  ;;  %v426_v53 = vpack.c.bf16 %v210_v52, %v209_v51  ;;  %v430_v56 = vpack.c.bf16 %v212_v55, %v211_v54  ;;  %v213_v57 = vld [vmem:[#allocation8 + $0x20] sm:$0xff]  ;;  %v214_v58 = vld [vmem:[#allocation8 + $0x28] sm:$0xff]  ;;  %v215_v60 = vld [vmem:[#allocation8 + $0x30] sm:$0xff] }
  0x45   :  { %v434_v59 = vpack.c.bf16 %v214_v58, %v213_v57  ;;  %v216_v61 = vld [vmem:[#allocation8 + $0x38] sm:$0xff]  ;;  %v217_v63 = vld [vmem:[#allocation8 + $0x40] sm:$0xff]  ;;  %v219_v2 = vld [vmem:[#allocation8 + $0x50] sm:$0xff] }
  0x46   :  { %427 = vmatprep.subr.bf16.mxu1 %v426_v53  ;;  %v438_v62 = vpack.c.bf16 %v216_v61, %v215_v60  ;;  %v220_v3 = vld [vmem:[#allocation8 + $0x58] sm:$0xff]  ;;  %v221_v5 = vld [vmem:[#allocation8 + $0x60] sm:$0xff]  ;;  %v222_v6 = vld [vmem:[#allocation8 + $0x68] sm:$0xff] }
  0x47   :  { %409 = vmatpush1.bf16.msra.mxu0 %v408_v26  ;;  %429 = vmatpush3.bf16.msra.mxu1 %v426_v53  ;;  %v446_v4 = vpack.c.bf16 %v220_v3, %v219_v2  ;;  %v450_v7 = vpack.c.bf16 %v222_v6, %v221_v5  ;;  %v223_v8 = vld [vmem:[#allocation8 + $0x70] sm:$0xff]  ;;  %v224_v9 = vld [vmem:[#allocation8 + $0x78] sm:$0xff] }
  0x48   :  { %411 = vmatprep.subr.bf16.mxu0 %v410_v27  ;;  %431 = vmatprep.subr.bf16.mxu1 %v430_v56  ;;  %v454_v10 = vpack.c.bf16 %v224_v9, %v223_v8  ;;  %v102_v14 = vld [vmem:[%s675_s2] sm:$0x3] }
  0x49   :  { %v107_v15 = vrot.slane %v102_v14, %v106_v13  ;;  %v111_v29 = vrot.slane %v102_v14, %v110_v28 }
  0x4b   :  { %413 = vmatpush1.bf16.msra.mxu0 %v412_v32  ;;  %433 = vmatpush3.bf16.msra.mxu1 %v430_v56 }
  0x4c   :  { %415 = vmatprep.subr.bf16.mxu0 %v414_v33  ;;  %435 = vmatprep.subr.bf16.mxu1 %v434_v59 }
  0x4f   :  { %417 = vmatpush1.bf16.msra.mxu0 %v416_v38  ;;  %437 = vmatpush3.bf16.msra.mxu1 %v434_v59  ;;  %v340_v38 = vld [vmem:[%s677_s4] ss:$0 sm:$0xff] }
  0x50   :  { %419 = vmatprep.subr.bf16.mxu0 %v418_v39  ;;  %439 = vmatprep.subr.bf16.mxu1 %v438_v62 }
  0x53   :  { %421 = vmatpush1.bf16.msra.mxu0 %v420_v44  ;;  %441 = vmatpush3.bf16.msra.mxu1 %v438_v62 }
  0x54   :  { %423 = vmatprep.subr.bf16.mxu0 %v422_v45 }
  0x57   :  { %425 = vmatpush1.bf16.msra.mxu0 %v424_v48 }
  0x5a   :  { %179 = vmatmul.mubr.f32.vlgmr.msra.gmra.mrb[0].mxu0 %v68_v49 }
  0x5b   :  { %184 = vmatprep.mubr.f32.mxu0 %v576_v0  ;;  %v218_v0 = vld [vmem:[#allocation8 + $0x48] sm:$0xff] }
  0x5c   :  { %v442_v1 = vpack.c.bf16 %v218_v0, %v217_v63 }
  0x5e   :  { %185 = vmatmul.mubr.f32.gmra.mrb[2].mxu0 %v69_v50  ;;  %443 = vmatprep.subr.bf16.mxu1 %v442_v1 }
  0x5f   :  { %445 = vmatpush3.bf16.msra.mxu1 %v442_v1 }
  0x60   :  { %447 = vmatprep.subr.bf16.mxu1 %v446_v4 }
  0x63   :  { %449 = vmatpush3.bf16.msra.mxu1 %v446_v4 }
  0x64   :  { %451 = vmatprep.subr.bf16.mxu1 %v450_v7 }
  0x67   :  { %453 = vmatpush3.bf16.msra.mxu1 %v450_v7 }
  0x68   :  { %455 = vmatprep.subr.bf16.mxu1 %v454_v10 }
  0x6b   :  { %457 = vmatpush3.bf16.msra.mxu1 %v454_v10 }
 0x12d   :  { %v180_v16 = vpop.f32.mrb[0].mxu0 }
 0x12e   :  { %v181_v17 = vadd.f32 %v180_v16, %v107_v15  ;;  %v182_v18 = vpop.f32.mrb[1].mxu0 }
 0x12f   :  { %v183_v31 = vadd.f32 %v182_v18, %v111_v29 }
 0x130   :  { %v338_v19 = vmul.f32 -1.442695, %v181_v17 }
 0x131   :  { %v186_v20 = vpop.f32.mrb[2].mxu0 }
 0x132   :  { %467 = vpow2.f32 %v338_v19  ;;  %v187_v21 = vadd.f32 %v186_v20, %v107_v15  ;;  %v188_v22 = vpop.f32.mrb[3].mxu0 }
 0x133   :  { %v189_v36 = vadd.f32 %v188_v22, %v111_v29 }
 0x134   :  { %v339_v23 = vmul.f32 -1.442695, %v187_v21 }
 0x136   :  { %469 = vpow2.f32 %v339_v23 }
 0x13c   :  { %v468_v24 = vpop.eup %467 }
 0x13d   :  { %v197_v25 = vadd.f32 1.0, %v468_v24 }
 0x13f   :  { %471 = vrcp.f32 %v197_v25 }
 0x140   :  { %v470_v26 = vpop.eup %469 }
 0x141   :  { %v198_v27 = vadd.f32 1.0, %v470_v26 }
 0x143   :  { %473 = vrcp.f32 %v198_v27 }
 0x149   :  { %v472_v30 = vpop.eup %471 }
 0x14a   :  { %v203_v32 = vmul.f32 %v472_v30, %v181_v17 }
 0x14c   :  { %v205_v33 = vmul.f32 %v203_v32, %v183_v31 }
 0x14d   :  { %v474_v34 = vpop.eup %473 }
 0x14e   :  { %v204_v35 = vmul.f32 %v474_v34, %v187_v21  ;;  %391 = vmatprep.mubr.f32.mxu1 %v205_v33 }
 0x150   :  { %v206_v37 = vmul.f32 %v204_v35, %v189_v36 }
 0x152   :  { %392 = vmatmul.mubr.f32.vlgmr.msra.gmra.mrb[0].mxu1 %v206_v37 }
 0x225   :  { %v393_v39 = vpop.f32.mrb[0].mxu1 }
 0x226   :  { %v317_v40 = vadd.f32 %v393_v39, %v340_v38  ;;  %v291_v41 = vpop.f32.mrb[1].mxu1 }
 0x227   :  { %v316_v42 = vadd.f32 %v340_v38, %v291_v41 }
 0x228   :  { %319 = vst [vmem:[#allocation9 + $0x8] sm:$0xff] %v317_v40 }
 0x229   :  { %318 = vst [vmem:[#allocation9] sm:$0xff] %v316_v42 }
 0x22a   :  { %552 = shalt.err (!%p549_p0)
}
 0x22b   :  { %s553_s4 = scalar_lea.hbm %s678_s5, 256 }
 0x22c   :  { %p554_p1 = scmp.ne.s32.totalorder %s678_s5, %s553_s4  ;;  %p557_p2 = scmp.lt.u32.totalorder %s553_s4, %s678_s5 }
 0x22e   :  { %p559_p3 = pnand %p557_p2, %p554_p1 }
 0x230   :  { %562 = shalt.err (!%p559_p3)
}
 0x231   :  { %331 = dma.vmem_to_hbm [thread:$0]  %s326_s9, 256, %s678_s5, [#allocation5], %s573_s1, %s573_s1, %s574_s17  }
 0x232   :  { %567 = dma.done.wait [#allocation5], 256  }
 0x233   :  { %568 = vsyncadd [#allocation5], 4294967040 }
 0x234   :  { %335 = vsyncpa [#allocation4], 1 }
 0x235   :  { %336 = vsyncpa [#allocation7], 1 }
 0x236   :  { %337 = vsyncpa [#allocation5], 1 }

</bundles_post_ra>
